<compile_context>
chip_gen: v5e
topology: v5e:2x2
jax: 0.10.0
libtpu: 0.0.40
codegen_flags: <defaults>
</compile_context>

<pallas_src>
import math

import jax
import jax.numpy as jnp
from jax.experimental import pallas as pl
from jax.experimental.pallas import tpu as pltpu

_MiB = 1024 * 1024


def _round_up(x, m):
    return (x + m - 1) // m * m


# ----------------------------- kernels --------------------------------------


def _patch_embed_kernel(x_ref, w_ref, b_ref, o_ref):
    # x_ref: (tm, K)   tile of flattened patches (compute dtype)
    # w_ref: (K, Np)   full projection weight, resident in VMEM across the grid
    # b_ref: (1, Np)   bias (f32)
    # o_ref: (tm, Np)  output tile
    acc = jnp.dot(x_ref[...], w_ref[...], preferred_element_type=jnp.float32)
    o_ref[...] = (acc + b_ref[...]).astype(o_ref.dtype)


def _patch_embed_kernel_ktiled(x_ref, w_ref, b_ref, o_ref, acc_ref):
    # Accumulator-tiled fallback for large K*N (weight cannot stay resident).
    k = pl.program_id(1)

    @pl.when(k == 0)
    def _():
        acc_ref[...] = jnp.zeros_like(acc_ref)

    acc_ref[...] += jnp.dot(x_ref[...], w_ref[...],
                            preferred_element_type=jnp.float32)

    @pl.when(k == pl.num_programs(1) - 1)
    def _():
        o_ref[...] = (acc_ref[...] + b_ref[...]).astype(o_ref.dtype)


# --------------------------- planning helpers --------------------------------


def _vmem_capacity_bytes():
    try:
        return int(pltpu.get_tpu_info().vmem_capacity_bytes)
    except Exception:
        return 64 * _MiB  # conservative default (v7x per-TC size)


def _multi_core_per_chip():
    # v7x has 2 TensorCores/chip; the "parallel" M axis is sharded across them.
    try:
        kind = jax.devices()[0].device_kind.lower()
    except Exception:
        return False
    return ("v7" in kind) or ("tpu7" in kind) or ("7x" in kind)


def _snap_to_divisor(M8, tm):
    """Prefer a tile that divides M8 exactly (no M pad pass, no garbage rows),
    as long as it does not shrink the tile by more than 2x."""
    t = tm
    while t >= 8 and M8 % t != 0:
        t -= 8
    if t >= 8 and 2 * t >= tm:
        return t
    return tm


def _pick_tm(M8, K, N, in_bytes, out_bytes, *, budget_bytes, resident_w_copies,
             tm_max=2048, min_steps=1):
    fixed = resident_w_copies * K * N * in_bytes + 2 * N * 4   # weight + bias
    per_row = 2 * (K * in_bytes + N * out_bytes)               # dbl-buffered x/out rows
    avail = max(budget_bytes - fixed, per_row * 8)
    tm = min(tm_max, avail // per_row)
    if min_steps > 1:
        tm = min(tm, max(8, (M8 // min_steps // 8) * 8))
    tm = max(8, (tm // 8) * 8)
    tm = min(tm, M8)
    return int(_snap_to_divisor(M8, tm))


def _pick_tk(K_pad, k_tile):
    """Largest multiple of 128 that divides K_pad and is <= cap."""
    cap = _round_up(k_tile, 128) if k_tile else 512
    cap = min(cap, K_pad)
    tk = 128
    t = 128
    while t <= cap:
        if K_pad % t == 0:
            tk = t
        t += 128
    return tk


def _pick_tiles_ktiled(M8, K_pad, N, in_bytes, out_bytes, *, budget_bytes,
                       k_tile=None, tm_max=2048, min_steps=1):
    tk = _pick_tk(K_pad, k_tile)
    fixed = 2 * tk * N * in_bytes + 2 * N * 4                   # dbl-buffered W tile + bias
    per_row = 2 * (tk * in_bytes + N * out_bytes) + N * 4       # x/out (dbl) + f32 acc
    avail = max(budget_bytes - fixed, per_row * 8)
    tm = min(tm_max, avail // per_row)
    if min_steps > 1:
        tm = min(tm, max(8, (M8 // min_steps // 8) * 8))
    tm = max(8, (tm // 8) * 8)
    tm = min(tm, M8)
    return int(_snap_to_divisor(M8, tm)), int(tk)


def _resident_spec(block_shape, index_map, single_buffer):
    # Resident (constant-index) operands do not need double buffering.
    if single_buffer:
        return pl.BlockSpec(block_shape, index_map, pipeline_mode=pl.Buffered(1))
    return pl.BlockSpec(block_shape, index_map)


# ------------------------------ wrapper --------------------------------------


def patch_embedding(im, weight, bias, patch_size, *,
                    compute_dtype=jnp.bfloat16, out_dtype=None,
                    force_k_tiled=False, k_tile=None):
    """im: (B, C, H, W). weight: (embed_dim, C, P, P). bias: (embed_dim,).

    Returns (B, num_patches, embed_dim) in out_dtype (default: im.dtype).
    """
    B, C, H, W = im.shape
    P = patch_size
    if H % P != 0 or W % P != 0:
        raise ValueError("image dimensions must be divisible by the patch size")
    Hg, Wg = H // P, W // P
    num_patches = Hg * Wg
    embed_dim = weight.shape[0]
    K = C * P * P
    M = B * num_patches
    out_dtype = im.dtype if out_dtype is None else out_dtype

    # Patch extraction producer chain (flatten order (C, P, P) matches the
    # Conv2d weight layout). With allow_input_fusion below, XLA may fuse this
    # whole chain into the pallas_call operand instead of materializing X.
    x = im.reshape(B, C, Hg, P, Wg, P)
    x = jnp.transpose(x, (0, 2, 4, 1, 3, 5)).reshape(M, K)
    w = weight.reshape(embed_dim, K).T                      # (K, N)
    b = bias.reshape(1, embed_dim).astype(jnp.float32)      # (1, N)

    x = x.astype(compute_dtype)
    w = w.astype(compute_dtype)

    in_bytes = jnp.dtype(compute_dtype).itemsize
    out_bytes = jnp.dtype(out_dtype).itemsize

    # Lane-dense K and N: pad both to multiples of 128 (zero padding is exact).
    K_pad = _round_up(K, 128)
    N_pad = _round_up(embed_dim, 128)
    if K_pad != K:
        x = jnp.pad(x, ((0, 0), (0, K_pad - K)))
        w = jnp.pad(w, ((0, K_pad - K), (0, 0)))
    if N_pad != embed_dim:
        w = jnp.pad(w, ((0, 0), (0, N_pad - embed_dim)))
        b = jnp.pad(b, ((0, 0), (0, N_pad - embed_dim)))

    # Generation-aware VMEM plan: ~96 MiB scoped on 128 MiB chips (v5e/v6e),
    # ~48 MiB on v7x (64 MiB per TC), minus headroom for compiler scratch.
    vmem_phys = _vmem_capacity_bytes()
    vmem_limit = max(32 * _MiB, min(96 * _MiB, (vmem_phys * 3) // 4))
    budget = vmem_limit - 4 * _MiB
    min_steps = 16 if _multi_core_per_chip() else 1

    M8 = _round_up(M, 8)

    # Resident-weight path only when even a double-buffered weight would fit
    # comfortably (so the Buffered(1)->default fallback can never OOM).
    use_k_tiled = force_k_tiled or (2 * K_pad * N_pad * in_bytes > budget // 3)

    def run(single_buffer_resident):
        w_copies = 1 if single_buffer_resident else 2
        if use_k_tiled:
            tm, tk = _pick_tiles_ktiled(
                M8, K_pad, N_pad, in_bytes, out_bytes, budget_bytes=budget,
                k_tile=k_tile, min_steps=min_steps)
        else:
            tm = _pick_tm(
                M8, K_pad, N_pad, in_bytes, out_bytes, budget_bytes=budget,
                resident_w_copies=w_copies, min_steps=min_steps)
            tk = K_pad

        M_pad = _round_up(M, tm)
        x_run = x if M_pad == M else jnp.pad(x, ((0, M_pad - M), (0, 0)))

        cost = pl.CostEstimate(
            flops=2 * M_pad * K_pad * N_pad,
            bytes_accessed=(M_pad * K_pad * in_bytes + K_pad * N_pad * in_bytes
                            + N_pad * 4 + M_pad * N_pad * out_bytes),
            transcendentals=0,
        )

        if use_k_tiled:
            grid = (M_pad // tm, K_pad // tk)
            in_specs = [
                pl.BlockSpec((tm, tk), lambda i, k: (i, k)),      # x, streamed
                pl.BlockSpec((tk, N_pad), lambda i, k: (k, 0)),   # weight tile
                _resident_spec((1, N_pad), lambda i, k: (0, 0),
                               single_buffer_resident),           # bias
            ]
            out_specs = pl.BlockSpec((tm, N_pad), lambda i, k: (i, 0))
            scratch = [pltpu.VMEM((tm, N_pad), jnp.float32)]      # f32 accumulator
            kernel = _patch_embed_kernel_ktiled
            dims = ("parallel", "arbitrary")
        else:
            grid = (M_pad // tm,)
            in_specs = [
                pl.BlockSpec((tm, K_pad), lambda i: (i, 0)),      # x, streamed over M
                _resident_spec((K_pad, N_pad), lambda i: (0, 0),
                               single_buffer_resident),           # weight, resident
                _resident_spec((1, N_pad), lambda i: (0, 0),
                               single_buffer_resident),           # bias, resident
            ]
            out_specs = pl.BlockSpec((tm, N_pad), lambda i: (i, 0))
            scratch = []
            kernel = _patch_embed_kernel
            dims = ("parallel",)

        # TODO(synk): if a profile shows exposed DMA on the x/out stream on
        # v7x, bump those specs to pipeline_mode=pl.Buffered(3).
        out = pl.pallas_call(
            kernel,
            out_shape=jax.ShapeDtypeStruct((M_pad, N_pad), out_dtype),
            grid=grid,
            in_specs=in_specs,
            out_specs=out_specs,
            scratch_shapes=scratch,
            compiler_params=pltpu.CompilerParams(
                dimension_semantics=dims,
                vmem_limit_bytes=vmem_limit,
                allow_input_fusion=[True, False, False],
            ),
            cost_estimate=cost,
        )(x_run, w, b)
        return out, M_pad

    try:
        out, M_pad = run(single_buffer_resident=True)
    except Exception:
        # Older jax/Mosaic may reject pipeline_mode=pl.Buffered(1) on the
        # resident operands; retry with default double buffering.
        out, M_pad = run(single_buffer_resident=False)

    if M_pad != M or N_pad != embed_dim:
        out = out[:M, :embed_dim]
    return out.reshape(B, num_patches, embed_dim)


# ------------------------------- test ----------------------------------------


def _ref_patch_embed(im, weight, bias, P):
    B, C, H, W = im.shape
    Hg, Wg = H // P, W // P
    E = weight.shape[0]
    xr = im.reshape(B, C, Hg, P, Wg, P)
    xr = jnp.transpose(xr, (0, 2, 4, 1, 3, 5)).reshape(B, Hg * Wg, -1)
    return xr @ weight.reshape(E, -1).T + bias


if __name__ == "__main__":
    key = jax.random.PRNGKey(0)
    k_im, k_w, k_b, k_im2, k_w2, k_b2 = jax.random.split(key, 6)

    # ---- config 1: B=2, C=4, 16x16 image, P=4, embed_dim=32 ----
    B, C, P, E = 2, 4, 4, 32
    H = W = 16
    im = jax.random.normal(k_im, (B, C, H, W), dtype=jnp.float32)
    fan_in = C * P * P
    bound = math.sqrt(1.0 / fan_in)
    weight = jax.random.uniform(k_w, (E, C, P, P), minval=-bound, maxval=bound,
                                dtype=jnp.float32)
    bias = jax.random.uniform(k_b, (E,), minval=-bound, maxval=bound,
                              dtype=jnp.float32)
    ref = _ref_patch_embed(im, weight, bias, P)

    # 1) bf16 MXU inputs + bf16 output (memory-bound-friendly path).
    out_bf16 = patch_embedding(im, weight, bias, P, out_dtype=jnp.bfloat16)
    out_bf16 = jax.block_until_ready(out_bf16)
    assert out_bf16.shape == ref.shape, out_bf16.shape
    assert out_bf16.dtype == jnp.bfloat16
    assert jnp.allclose(out_bf16.astype(jnp.float32), ref, atol=5e-2, rtol=5e-2)

    # 2) f32 compute, default (f32) output -- tight correctness check.
    out_f32 = patch_embedding(im, weight, bias, P, compute_dtype=jnp.float32)
    out_f32 = jax.block_until_ready(out_f32)
    assert jnp.allclose(out_f32, ref, atol=1e-5, rtol=1e-5)

    # ---- config 2: exercise the K-tiled accumulator fallback (2 K steps) ----
    B2, C2, P2, E2 = 2, 4, 8, 32
    H2 = W2 = 16
    im2 = jax.random.normal(k_im2, (B2, C2, H2, W2), dtype=jnp.float32)
    fan_in2 = C2 * P2 * P2
    bound2 = math.sqrt(1.0 / fan_in2)
    weight2 = jax.random.uniform(k_w2, (E2, C2, P2, P2), minval=-bound2,
                                 maxval=bound2, dtype=jnp.float32)
    bias2 = jax.random.uniform(k_b2, (E2,), minval=-bound2, maxval=bound2,
                               dtype=jnp.float32)
    ref2 = _ref_patch_embed(im2, weight2, bias2, P2)

    out_kt = patch_embedding(im2, weight2, bias2, P2, compute_dtype=jnp.float32,
                             force_k_tiled=True, k_tile=128)
    out_kt = jax.block_until_ready(out_kt)
    assert out_kt.shape == ref2.shape, out_kt.shape
    assert jnp.allclose(out_kt, ref2, atol=1e-5, rtol=1e-5)

    print("KERNEL_OK")
</pallas_src>

<mosaic_0001>
module attributes {stable_mosaic.version = 11 : i64} {
  func.func @_patch_embed_kernel(%arg0: i32, %arg1: memref<32x128xbf16, #tpu.memory_space<vmem>>, %arg2: memref<128x128xbf16, #tpu.memory_space<vmem>>, %arg3: memref<1x128xf32, #tpu.memory_space<vmem>>, %arg4: memref<32x128xbf16, #tpu.memory_space<vmem>>) attributes {dimension_semantics = [#tpu.dimension_semantics<parallel>], iteration_bounds = array<i64: 1>, scalar_prefetch = 0 : i64, scratch_operands = 0 : i64, tpu.core_type = #tpu.core_type<tc>, window_params = [{transform_indices = @transform_0, window_bounds = array<i64: 32, 128>}, {pipeline_mode = #tpu.pipeline_mode<synchronous>, transform_indices = @transform_1, window_bounds = array<i64: 128, 128>}, {pipeline_mode = #tpu.pipeline_mode<synchronous>, transform_indices = @transform_2, window_bounds = array<i64: 1, 128>}, {transform_indices = @transform_3, window_bounds = array<i64: 32, 128>}]} {
    %c0 = arith.constant 0 : index
    %c0_0 = arith.constant 0 : index
    %0 = vector.load %arg1[%c0, %c0_0] : memref<32x128xbf16, #tpu.memory_space<vmem>>, vector<32x128xbf16>
    %c0_1 = arith.constant 0 : index
    %c0_2 = arith.constant 0 : index
    %1 = vector.load %arg2[%c0_1, %c0_2] : memref<128x128xbf16, #tpu.memory_space<vmem>>, vector<128x128xbf16>
    %cst = arith.constant dense<0.000000e+00> : vector<32x128xf32>
    %2 = tpu.matmul %0, %1, %cst {dimension_numbers = #tpu.dot_dimension_numbers<[1], [0], [0], [1], [0, 0, 1, 1], [], []>} : vector<32x128xbf16>, vector<128x128xbf16>, vector<32x128xf32> -> vector<32x128xf32>
    %c0_3 = arith.constant 0 : index
    %c0_4 = arith.constant 0 : index
    %3 = vector.load %arg3[%c0_3, %c0_4] : memref<1x128xf32, #tpu.memory_space<vmem>>, vector<1x128xf32>
    %4 = vector.broadcast %3 : vector<1x128xf32> to vector<32x128xf32>
    %5 = arith.addf %2, %4 : vector<32x128xf32>
    %6 = arith.truncf %5 : vector<32x128xf32> to vector<32x128xbf16>
    %c0_5 = arith.constant 0 : index
    %c0_6 = arith.constant 0 : index
    %7 = vector.load %arg4[%c0_5, %c0_6] : memref<32x128xbf16, #tpu.memory_space<vmem>>, vector<32x128xbf16>
    tpu.vector_store %arg4[%c0_5, %c0_6], %6 {strides = array<i32>} : memref<32x128xbf16, #tpu.memory_space<vmem>>, vector<32x128xbf16>,
    return
  }
  func.func @transform_0(%arg0: i32) -> (i32, i32) {
    %c0_i32 = arith.constant 0 : i32
    %c0_i32_0 = arith.constant 0 : i32
    return %arg0, %c0_i32 : i32, i32
  }
  func.func @transform_1(%arg0: i32) -> (i32, i32) {
    %c0_i32 = arith.constant 0 : i32
    %c0_i32_0 = arith.constant 0 : i32
    %c0_i32_1 = arith.constant 0 : i32
    return %c0_i32, %c0_i32_0 : i32, i32
  }
  func.func @transform_2(%arg0: i32) -> (i32, i32) {
    %c0_i32 = arith.constant 0 : i32
    %c0_i32_0 = arith.constant 0 : i32
    %c0_i32_1 = arith.constant 0 : i32
    return %c0_i32, %c0_i32_0 : i32, i32
  }
  func.func @transform_3(%arg0: i32) -> (i32, i32) {
    %c0_i32 = arith.constant 0 : i32
    %c0_i32_0 = arith.constant 0 : i32
    return %arg0, %c0_i32 : i32, i32
  }
}

module attributes {stable_mosaic.version = 11 : i64} {
  func.func @_patch_embed_kernel(%arg0: i32, %arg1: memref<32x128xbf16, #tpu.memory_space<vmem>>, %arg2: memref<128x128xbf16, #tpu.memory_space<vmem>>, %arg3: memref<1x128xf32, #tpu.memory_space<vmem>>, %arg4: memref<32x128xbf16, #tpu.memory_space<vmem>>) attributes {dimension_semantics = [#tpu.dimension_semantics<parallel>], iteration_bounds = array<i64: 1>, scalar_prefetch = 0 : i64, scratch_operands = 0 : i64, tpu.core_type = #tpu.core_type<tc>, window_params = [{transform_indices = @transform_0, window_bounds = array<i64: 32, 128>}, {pipeline_mode = #tpu.pipeline_mode<synchronous>, transform_indices = @transform_1, window_bounds = array<i64: 128, 128>}, {pipeline_mode = #tpu.pipeline_mode<synchronous>, transform_indices = @transform_2, window_bounds = array<i64: 1, 128>}, {transform_indices = @transform_3, window_bounds = array<i64: 32, 128>}]} {
    %c0 = arith.constant 0 : index
    %c0_0 = arith.constant 0 : index
    %0 = vector.load %arg1[%c0, %c0_0] : memref<32x128xbf16, #tpu.memory_space<vmem>>, vector<32x128xbf16>
    %c0_1 = arith.constant 0 : index
    %c0_2 = arith.constant 0 : index
    %1 = vector.load %arg2[%c0_1, %c0_2] : memref<128x128xbf16, #tpu.memory_space<vmem>>, vector<128x128xbf16>
    %cst = arith.constant dense<0.000000e+00> : vector<32x128xf32>
    %2 = tpu.matmul %0, %1, %cst {dimension_numbers = #tpu.dot_dimension_numbers<[1], [0], [0], [1], [0, 0, 1, 1], [], []>} : vector<32x128xbf16>, vector<128x128xbf16>, vector<32x128xf32> -> vector<32x128xf32>
    %c0_3 = arith.constant 0 : index
    %c0_4 = arith.constant 0 : index
    %3 = vector.load %arg3[%c0_3, %c0_4] : memref<1x128xf32, #tpu.memory_space<vmem>>, vector<1x128xf32>
    %4 = vector.broadcast %3 : vector<1x128xf32> to vector<32x128xf32>
    %5 = arith.addf %2, %4 : vector<32x128xf32>
    %6 = arith.truncf %5 : vector<32x128xf32> to vector<32x128xbf16>
    %c0_5 = arith.constant 0 : index
    %c0_6 = arith.constant 0 : index
    %7 = vector.load %arg4[%c0_5, %c0_6] : memref<32x128xbf16, #tpu.memory_space<vmem>>, vector<32x128xbf16>
    tpu.vector_store %arg4[%c0_5, %c0_6], %6 {strides = array<i32>} : memref<32x128xbf16, #tpu.memory_space<vmem>>, vector<32x128xbf16>,
    return
  }
  func.func @transform_0(%arg0: i32) -> (i32, i32) {
    %c0_i32 = arith.constant 0 : i32
    %c0_i32_0 = arith.constant 0 : i32
    return %arg0, %c0_i32 : i32, i32
  }
  func.func @transform_1(%arg0: i32) -> (i32, i32) {
    %c0_i32 = arith.constant 0 : i32
    %c0_i32_0 = arith.constant 0 : i32
    %c0_i32_1 = arith.constant 0 : i32
    return %c0_i32, %c0_i32_0 : i32, i32
  }
  func.func @transform_2(%arg0: i32) -> (i32, i32) {
    %c0_i32 = arith.constant 0 : i32
    %c0_i32_0 = arith.constant 0 : i32
    %c0_i32_1 = arith.constant 0 : i32
    return %c0_i32, %c0_i32_0 : i32, i32
  }
  func.func @transform_3(%arg0: i32) -> (i32, i32) {
    %c0_i32 = arith.constant 0 : i32
    %c0_i32_0 = arith.constant 0 : i32
    return %arg0, %c0_i32 : i32, i32
  }
}

</mosaic_0001>

<bundles_post_ra>
// kernel: tpu_custom_call.1
= control target key start
LH: loop header
LB: loop body
LE: loop exit
PB: predicated region body
PF: predicated region fallthrough
CT: control target
= control target key end

     0   :  { %8 = vsyncpa [#allocation3], 0  ;;  %s377_s0 = inlined_call_operand.hbm [shape: bf16[32,128], index: 0, kind: input, shape index: {}]   ;;  %s378_s1 = inlined_call_operand.hbm [shape: bf16[128,128], index: 1, kind: input, shape index: {}]   ;;  %s379_s2 = inlined_call_operand.vmem [shape: f32[1,128], index: 2, kind: input, shape index: {}]   ;;  %s380_s3 = inlined_call_operand.hbm [shape: bf16[32,128], index: 3, kind: output, shape index: {}]  }
   0x1   :  { %9 = vsyncpa [#allocation6], 0 }
   0x2   :  { %10 = vsyncpa [#allocation4], 0  ;;  %s15_s14 = sshll.u32 %s377_s0, 4  ;;  %s331_s15 = smov [#allocation2]   ;;  %s16_s14 = int_to_ptr.hbm [resolvable:$true] %s15_s14 }
   0x3   :  { %s17_s16 = sshll.u32 %s331_s15, 4  ;;  %s28_s19 = sshll.u32 %s378_s1, 4  ;;  %s18_s16 = int_to_ptr.vmem [resolvable:$true] %s17_s16  ;;  %s29_s19 = int_to_ptr.hbm [resolvable:$true] %s28_s19 }
   0x4   :  { %s332_s20 = smov 64   ;;  %s333_s21 = smov 4  }
   0x5   :  { %23 = dma.hbm_to_vmem [thread:$0]  %s16_s14, 256, %s18_s16, [#allocation3], %s332_s20, %s332_s20, %s333_s21  }
   0x6   :  { %s334_s22 = smov [#allocation5]  }
   0x7   :  { %s30_s23 = sshll.u32 %s334_s22, 4  ;;  %s31_s23 = int_to_ptr.vmem [resolvable:$true] %s30_s23 }
   0x8   :  { %36 = dma.hbm_to_vmem [thread:$0]  %s29_s19, 1024, %s31_s23, [#allocation6], %s332_s20, %s332_s20, %s333_s21  }
   0x9   :  { %325 = dma.done.wait [#allocation3], 256  }
   0xa   :  { %326 = vsyncadd [#allocation3], 4294967040 }
   0xb   :  { %327 = dma.done.wait [#allocation6], 1024  }
   0xc   :  { %328 = vsyncadd [#allocation6], 4294966272  ;;  %v227_v0 = vld [vmem:[#allocation5 + $0x38] sm:$0xff]  ;;  %v226_v1 = vld [vmem:[#allocation5 + $0x30] sm:$0xff]  ;;  %s335_s24 = smov [#allocation7]   ;;  %s164_s28 = sshll.u32 %s380_s3, 4  ;;  %s165_s28 = int_to_ptr.hbm [resolvable:$true] %s164_s28 }
   0xd   :  { %131 = vmatpush.bf16.msra.mxu0 %v227_v0  ;;  %239 = vmatpush.bf16.msra.mxu1 %v227_v0  ;;  %v225_v2 = vld [vmem:[#allocation5 + $0x28] sm:$0xff]  ;;  %v224_v3 = vld [vmem:[#allocation5 + $0x20] sm:$0xff]  ;;  %v223_v4 = vld [vmem:[#allocation5 + $0x18] sm:$0xff]  ;;  %s162_s25 = sshll.u32 %s335_s24, 4  ;;  %s163_s25 = int_to_ptr.vmem [resolvable:$true] %s162_s25 }
   0xe   :  { %v222_v5 = vld [vmem:[#allocation5 + $0x10] sm:$0xff]  ;;  %v221_v6 = vld [vmem:[#allocation5 + $0x8] sm:$0xff]  ;;  %v220_v7 = vld [vmem:[#allocation5] sm:$0xff] }
   0xf   :  { %v218_v8 = vld [vmem:[#allocation2] sm:$0xff]  ;;  %v219_v9 = vld [vmem:[#allocation2 + $0x8] sm:$0xff] }
  0x10   :  { %v252_v12 = vld [vmem:[%s379_s2] ss:$0 sm:$0xff] }
  0x11   :  { %132 = vmatpush.bf16.msra.mxu0 %v226_v1  ;;  %240 = vmatpush.bf16.msra.mxu1 %v226_v1 }
  0x15   :  { %133 = vmatpush.bf16.msra.mxu0 %v225_v2  ;;  %241 = vmatpush.bf16.msra.mxu1 %v225_v2 }
  0x19   :  { %134 = vmatpush.bf16.msra.mxu0 %v224_v3  ;;  %242 = vmatpush.bf16.msra.mxu1 %v224_v3 }
  0x1d   :  { %135 = vmatpush.bf16.msra.mxu0 %v223_v4  ;;  %243 = vmatpush.bf16.msra.mxu1 %v223_v4 }
  0x21   :  { %136 = vmatpush.bf16.msra.mxu0 %v222_v5  ;;  %244 = vmatpush.bf16.msra.mxu1 %v222_v5 }
  0x25   :  { %137 = vmatpush.bf16.msra.mxu0 %v221_v6  ;;  %245 = vmatpush.bf16.msra.mxu1 %v221_v6 }
  0x29   :  { %138 = vmatpush.bf16.msra.mxu0 %v220_v7  ;;  %246 = vmatpush.bf16.msra.mxu1 %v220_v7 }
  0x2c   :  { %139 = vmatmul.bf16.vlgmr.msra.gmra.mxu0 %v218_v8  ;;  %144 = vmatmul.bf16.vlgmr.msra.gmra.mxu1 %v219_v9 }
  0xa9   :  { %v140_v10 = vpop.f32.mrf.mxu0  ;;  %v145_v11 = vpop.f32.mrf.mxu1 }
  0xaa   :  { %v141_v15 = vadd.f32 %v252_v12, %v140_v10  ;;  %v146_v16 = vadd.f32 %v252_v12, %v145_v11 }
  0xb1   :  { %v142_v13 = vpop.f32.mrf.mxu0  ;;  %v147_v14 = vpop.f32.mrf.mxu1 }
  0xb2   :  { %v143_v17 = vadd.f32 %v252_v12, %v142_v13  ;;  %v148_v18 = vadd.f32 %v252_v12, %v147_v14 }
  0xb4   :  { %v231_v19 = vpack.c.bf16 %v143_v17, %v141_v15  ;;  %v236_v20 = vpack.c.bf16 %v148_v18, %v146_v16 }
  0xb6   :  { %232 = vst [vmem:[#allocation7] sm:$0xff] %v231_v19  }
  0xb7   :  { %238 = vst [vmem:[#allocation7 + $0x8] sm:$0xff] %v236_v20  }
  0xb8   :  { %170 = dma.vmem_to_hbm [thread:$0]  %s163_s25, 256, %s165_s28, [#allocation4], %s332_s20, %s332_s20, %s333_s21  }
  0xb9   :  { %329 = dma.done.wait [#allocation4], 256  }
  0xba   :  { %330 = vsyncadd [#allocation4], 4294967040 }
  0xbb   :  { %175 = vsyncpa [#allocation3], 1 }
  0xbc   :  { %176 = vsyncpa [#allocation6], 1 }
  0xbd   :  { %177 = vsyncpa [#allocation4], 1 }

// kernel: tpu_custom_call.1
= control target key start
LH: loop header
LB: loop body
LE: loop exit
PB: predicated region body
PF: predicated region fallthrough
CT: control target
= control target key end

     0   :  { %8 = vsyncpa [#allocation3], 0  ;;  %s377_s0 = inlined_call_operand.hbm [shape: bf16[32,128], index: 0, kind: input, shape index: {}]   ;;  %s378_s1 = inlined_call_operand.hbm [shape: bf16[128,128], index: 1, kind: input, shape index: {}]   ;;  %s379_s2 = inlined_call_operand.vmem [shape: f32[1,128], index: 2, kind: input, shape index: {}]   ;;  %s380_s3 = inlined_call_operand.hbm [shape: bf16[32,128], index: 3, kind: output, shape index: {}]  }
   0x1   :  { %9 = vsyncpa [#allocation6], 0 }
   0x2   :  { %10 = vsyncpa [#allocation4], 0  ;;  %s15_s14 = sshll.u32 %s377_s0, 4  ;;  %s331_s15 = smov [#allocation2]   ;;  %s16_s14 = int_to_ptr.hbm [resolvable:$true] %s15_s14 }
   0x3   :  { %s17_s16 = sshll.u32 %s331_s15, 4  ;;  %s28_s19 = sshll.u32 %s378_s1, 4  ;;  %s18_s16 = int_to_ptr.vmem [resolvable:$true] %s17_s16  ;;  %s29_s19 = int_to_ptr.hbm [resolvable:$true] %s28_s19 }
   0x4   :  { %s332_s20 = smov 64   ;;  %s333_s21 = smov 4  }
   0x5   :  { %23 = dma.hbm_to_vmem [thread:$0]  %s16_s14, 256, %s18_s16, [#allocation3], %s332_s20, %s332_s20, %s333_s21  }
   0x6   :  { %s334_s22 = smov [#allocation5]  }
   0x7   :  { %s30_s23 = sshll.u32 %s334_s22, 4  ;;  %s31_s23 = int_to_ptr.vmem [resolvable:$true] %s30_s23 }
   0x8   :  { %36 = dma.hbm_to_vmem [thread:$0]  %s29_s19, 1024, %s31_s23, [#allocation6], %s332_s20, %s332_s20, %s333_s21  }
   0x9   :  { %325 = dma.done.wait [#allocation3], 256  }
   0xa   :  { %326 = vsyncadd [#allocation3], 4294967040 }
   0xb   :  { %327 = dma.done.wait [#allocation6], 1024  }
   0xc   :  { %328 = vsyncadd [#allocation6], 4294966272  ;;  %v227_v0 = vld [vmem:[#allocation5 + $0x38] sm:$0xff]  ;;  %v226_v1 = vld [vmem:[#allocation5 + $0x30] sm:$0xff]  ;;  %s335_s24 = smov [#allocation7]   ;;  %s164_s28 = sshll.u32 %s380_s3, 4  ;;  %s165_s28 = int_to_ptr.hbm [resolvable:$true] %s164_s28 }
   0xd   :  { %131 = vmatpush.bf16.msra.mxu0 %v227_v0  ;;  %239 = vmatpush.bf16.msra.mxu1 %v227_v0  ;;  %v225_v2 = vld [vmem:[#allocation5 + $0x28] sm:$0xff]  ;;  %v224_v3 = vld [vmem:[#allocation5 + $0x20] sm:$0xff]  ;;  %v223_v4 = vld [vmem:[#allocation5 + $0x18] sm:$0xff]  ;;  %s162_s25 = sshll.u32 %s335_s24, 4  ;;  %s163_s25 = int_to_ptr.vmem [resolvable:$true] %s162_s25 }
   0xe   :  { %v222_v5 = vld [vmem:[#allocation5 + $0x10] sm:$0xff]  ;;  %v221_v6 = vld [vmem:[#allocation5 + $0x8] sm:$0xff]  ;;  %v220_v7 = vld [vmem:[#allocation5] sm:$0xff] }
   0xf   :  { %v218_v8 = vld [vmem:[#allocation2] sm:$0xff]  ;;  %v219_v9 = vld [vmem:[#allocation2 + $0x8] sm:$0xff] }
  0x10   :  { %v252_v12 = vld [vmem:[%s379_s2] ss:$0 sm:$0xff] }
  0x11   :  { %132 = vmatpush.bf16.msra.mxu0 %v226_v1  ;;  %240 = vmatpush.bf16.msra.mxu1 %v226_v1 }
  0x15   :  { %133 = vmatpush.bf16.msra.mxu0 %v225_v2  ;;  %241 = vmatpush.bf16.msra.mxu1 %v225_v2 }
  0x19   :  { %134 = vmatpush.bf16.msra.mxu0 %v224_v3  ;;  %242 = vmatpush.bf16.msra.mxu1 %v224_v3 }
  0x1d   :  { %135 = vmatpush.bf16.msra.mxu0 %v223_v4  ;;  %243 = vmatpush.bf16.msra.mxu1 %v223_v4 }
  0x21   :  { %136 = vmatpush.bf16.msra.mxu0 %v222_v5  ;;  %244 = vmatpush.bf16.msra.mxu1 %v222_v5 }
  0x25   :  { %137 = vmatpush.bf16.msra.mxu0 %v221_v6  ;;  %245 = vmatpush.bf16.msra.mxu1 %v221_v6 }
  0x29   :  { %138 = vmatpush.bf16.msra.mxu0 %v220_v7  ;;  %246 = vmatpush.bf16.msra.mxu1 %v220_v7 }
  0x2c   :  { %139 = vmatmul.bf16.vlgmr.msra.gmra.mxu0 %v218_v8  ;;  %144 = vmatmul.bf16.vlgmr.msra.gmra.mxu1 %v219_v9 }
  0xa9   :  { %v140_v10 = vpop.f32.mrf.mxu0  ;;  %v145_v11 = vpop.f32.mrf.mxu1 }
  0xaa   :  { %v141_v15 = vadd.f32 %v252_v12, %v140_v10  ;;  %v146_v16 = vadd.f32 %v252_v12, %v145_v11 }
  0xb1   :  { %v142_v13 = vpop.f32.mrf.mxu0  ;;  %v147_v14 = vpop.f32.mrf.mxu1 }
  0xb2   :  { %v143_v17 = vadd.f32 %v252_v12, %v142_v13  ;;  %v148_v18 = vadd.f32 %v252_v12, %v147_v14 }
  0xb4   :  { %v231_v19 = vpack.c.bf16 %v143_v17, %v141_v15  ;;  %v236_v20 = vpack.c.bf16 %v148_v18, %v146_v16 }
  0xb6   :  { %232 = vst [vmem:[#allocation7] sm:$0xff] %v231_v19  }
  0xb7   :  { %238 = vst [vmem:[#allocation7 + $0x8] sm:$0xff] %v236_v20  }
  0xb8   :  { %170 = dma.vmem_to_hbm [thread:$0]  %s163_s25, 256, %s165_s28, [#allocation4], %s332_s20, %s332_s20, %s333_s21  }
  0xb9   :  { %329 = dma.done.wait [#allocation4], 256  }
  0xba   :  { %330 = vsyncadd [#allocation4], 4294967040 }
  0xbb   :  { %175 = vsyncpa [#allocation3], 1 }
  0xbc   :  { %176 = vsyncpa [#allocation6], 1 }
  0xbd   :  { %177 = vsyncpa [#allocation4], 1 }

</bundles_post_ra>
